<compile_context>
chip_gen: v6e
topology: v6e:2x2x1
jax: 0.10.0
libtpu: 0.0.40
codegen_flags: <defaults>
</compile_context>

<pallas_src>
import math
import functools

import jax
import jax.numpy as jnp
from jax import lax
from jax.experimental import pallas as pl
from jax.experimental.pallas import tpu as pltpu


# ----------------------------- helpers ------------------------------------ #

def _skew_rows(pos, width, impl):
    """[TQ, S] -> [TQ, width] band layout: out[q, j] = pos[q, j - q] wherever
    0 <= j - q < S.  Out-of-band entries are unspecified (masked by caller).

    impl="roll":  single strided XLU rotate (fast path).
    impl="shift": log-step conditional lane shifts (robust fallback).
    """
    tq, s = pos.shape
    if impl == "roll":
        # Pad the lane dim up to a multiple of 128 so the strided rotate works on
        # a lane-native width, then rotate row q right by q and crop to `width`.
        w_roll = max(128, ((width + 127) // 128) * 128)
        padded = jnp.concatenate(
            [pos, jnp.zeros((tq, w_roll - s), pos.dtype)], axis=1)
        rolled = pltpu.roll(padded, 0, 1, stride=1, stride_axis=0)
        return rolled[:, :width]
    elif impl == "shift":
        x = jnp.concatenate(
            [pos, jnp.zeros((tq, width - s), pos.dtype)], axis=1)
        row = lax.broadcasted_iota(jnp.int32, (tq, width), 0)
        # Shift row q right by q via its binary decomposition (log2(TQ) steps).
        for b in range(max(0, (tq - 1).bit_length())):
            step = 1 << b
            shifted = jnp.concatenate(
                [jnp.zeros((tq, step), x.dtype), x[:, : width - step]], axis=1)
            x = jnp.where(((row >> b) & 1) == 1, shifted, x)
        return x
    else:
        raise ValueError(f"unknown pos_impl: {impl!r}")


# ----------------------------- Pallas kernel ------------------------------ #

def _seq_attention_kernel(q_ref, k_ref, v_ref, pe_ref, o_ref, *, hidden, pos_impl):
    # Per grid step (one batch element b, one query tile t):
    #   q_ref  : [1, TQ,    H]   rows [t*TQ, (t+1)*TQ)
    #   k_ref  : [1, M + S, H]   full sequence for batch b (re-used across t)
    #   v_ref  : [1, M + S, H]
    #   pe_ref : [1, H,     S]
    #   o_ref  : [1, TQ,    H]
    tq = q_ref.shape[1]
    span = pe_ref.shape[2]
    w = tq + span
    scale = 1.0 / math.sqrt(hidden)

    t = pl.program_id(1)
    start = pl.multiple_of(t * tq, tq)       # window start inside the K/V block

    q = q_ref[0, :, :]                       # [TQ, H]
    k_win = k_ref[0, pl.ds(start, w), :]     # [W, H]
    v_win = v_ref[0, pl.ds(start, w), :]     # [W, H]
    pe = pe_ref[0, :, :]                     # [H, S]

    # Content scores for the whole window in one MXU matmul, contracting over H
    # (no explicit K transpose).
    scores = lax.dot_general(q, k_win, (((1,), (1,)), ((), ())),
                             preferred_element_type=jnp.float32)      # [TQ, W]

    # Positional scores: one matmul per tile, skewed into band coordinates.
    pos = jnp.dot(q, pe, preferred_element_type=jnp.float32)          # [TQ, S]
    pos_band = _skew_rows(pos, w, pos_impl)                           # [TQ, W]

    # Band mask: window column j holds key (t*TQ + j); it is attended by local
    # query row q iff 0 <= j - q < span.
    rows = lax.broadcasted_iota(jnp.int32, (tq, w), 0)
    cols = lax.broadcasted_iota(jnp.int32, (tq, w), 1)
    rel = cols - rows
    in_band = (rel >= 0) & (rel < span)

    logits = (scores + pos_band) * scale
    logits = jnp.where(in_band, logits, jnp.float32(-1e30))

    # Softmax over the window (each row has exactly `span` unmasked entries).
    m = jnp.max(logits, axis=-1, keepdims=True)
    p = jnp.exp(logits - m)
    denom = jnp.sum(p, axis=-1, keepdims=True)
    # approx=True would move the divide onto the EUP; kept exact so the
    # reference comparison stays tight.
    p = p * pl.reciprocal(denom, approx=False)

    out = jnp.dot(p.astype(v_win.dtype), v_win,
                  preferred_element_type=jnp.float32)                 # [TQ, H]
    o_ref[0, :, :] = out.astype(o_ref.dtype)


def seq_attention(query, key, value, key_pe, *, attn_span, hidden_size,
                  block_q=128, pos_impl="roll"):
    B, M, H = query.shape
    S = attn_span
    assert key.shape == (B, M + S, H)
    assert value.shape == (B, M + S, H)
    assert key_pe.shape == (1, H, S)

    tq = min(block_q, M)
    if M % tq != 0:
        raise ValueError(f"sequence length {M} must be divisible by query tile {tq}")
    n_q_tiles = M // tq

    kernel = functools.partial(_seq_attention_kernel,
                               hidden=hidden_size, pos_impl=pos_impl)

    return pl.pallas_call(
        kernel,
        out_shape=jax.ShapeDtypeStruct((B, M, H), query.dtype),
        grid=(B, n_q_tiles),
        in_specs=[
            pl.BlockSpec((1, tq, H), lambda b, t: (b, t, 0)),
            # Full K/V sequence per batch element; the block index ignores t, so
            # Pallas DMAs it once per batch and re-uses it across query tiles.
            pl.BlockSpec((1, M + S, H), lambda b, t: (b, 0, 0)),
            pl.BlockSpec((1, M + S, H), lambda b, t: (b, 0, 0)),
            pl.BlockSpec((1, H, S), lambda b, t: (0, 0, 0)),
        ],
        out_specs=pl.BlockSpec((1, tq, H), lambda b, t: (b, t, 0)),
        compiler_params=pltpu.CompilerParams(
            dimension_semantics=("parallel", "parallel"),
            vmem_limit_bytes=48 * 1024 * 1024,   # safe on v7x (64 MiB VMEM)
        ),
    )(query, key, value, key_pe)


# ----------------------- Pure-JAX reference (PyTorch math) ----------------- #

def _skew_jax(X, pad_value):
    B, M, L = X.shape
    X = jnp.pad(X, ((0, 0), (0, 0), (0, M + 1)), constant_values=pad_value)
    X = X.reshape(B, -1)[:, :-M]
    return X.reshape(B, M, M + L)


def _unskew_jax(X):
    B, M, L = X.shape
    L -= M
    X = X.reshape(B, -1)
    X = jnp.pad(X, ((0, 0), (0, M)))
    X = X.reshape(B, M, M + L + 1)
    return X[:, :, :L]


def seq_attention_ref(query, key, value, key_pe, hidden_size):
    attn_cont = jnp.einsum('bmh,bnh->bmn', query, key)
    attn_cont = _unskew_jax(attn_cont)
    attn_pos = jnp.einsum('bmh,xhs->bms', query, key_pe)
    attn = (attn_cont + attn_pos) / math.sqrt(hidden_size)
    attn = jax.nn.softmax(attn, axis=-1)
    # dropout is identity (eval / p=0); adaptive span disabled
    attn_cont = _skew_jax(attn, 0.0)
    return jnp.einsum('bmn,bnh->bmh', attn_cont, value)


# ---------------------------------- main ----------------------------------- #

if __name__ == "__main__":
    ATOL = RTOL = 1e-3

    def run_case(case_key, B, M, H, S, block_q):
        kq, kk, kv, kp = jax.random.split(case_key, 4)
        query = jax.random.normal(kq, (B, M, H), dtype=jnp.float32)
        key_ = jax.random.normal(kk, (B, M + S, H), dtype=jnp.float32)
        value = jax.random.normal(kv, (B, M + S, H), dtype=jnp.float32)
        key_pe = jax.random.normal(kp, (1, H, S), dtype=jnp.float32)

        ref = seq_attention_ref(query, key_, value, key_pe, H)

        out = None
        try:
            cand = seq_attention(query, key_, value, key_pe, attn_span=S,
                                 hidden_size=H, block_q=block_q, pos_impl="roll")
            cand = jax.block_until_ready(cand)
            if bool(jnp.allclose(cand, ref, atol=ATOL, rtol=RTOL)):
                out = cand
        except Exception:
            out = None
        if out is None:
            # TODO(synk): strided pltpu.roll skew unavailable/incorrect on this
            # backend; using the log-step shift skew fallback instead.
            out = seq_attention(query, key_, value, key_pe, attn_span=S,
                                hidden_size=H, block_q=block_q, pos_impl="shift")
            out = jax.block_until_ready(out)

        assert out.shape == (B, M, H)
        assert jnp.allclose(out, ref, atol=ATOL, rtol=RTOL), "mismatch vs reference"

    k1, k2 = jax.random.split(jax.random.PRNGKey(0), 2)
    # Small shapes consistent with the module (hidden=16, span=16, seq=16, batch=2).
    run_case(k1, B=2, M=16, H=16, S=16, block_q=16)
    # Multi-tile path (exercises the 128-row query tile and window slicing).
    run_case(k2, B=2, M=256, H=16, S=64, block_q=128)

    print("KERNEL_OK")
</pallas_src>

<mosaic_0001>
module attributes {stable_mosaic.version = 11 : i64} {
  func.func @_seq_attention_kernel(%arg0: i32, %arg1: i32, %arg2: memref<1x16x16xf32, #tpu.memory_space<vmem>>, %arg3: memref<1x32x16xf32, #tpu.memory_space<vmem>>, %arg4: memref<1x32x16xf32, #tpu.memory_space<vmem>>, %arg5: memref<1x16x16xf32, #tpu.memory_space<vmem>>, %arg6: memref<1x16x16xf32, #tpu.memory_space<vmem>>) attributes {dimension_semantics = [#tpu.dimension_semantics<parallel>, #tpu.dimension_semantics<parallel>], iteration_bounds = array<i64: 2, 1>, scalar_prefetch = 0 : i64, scratch_operands = 0 : i64, tpu.core_type = #tpu.core_type<tc>, window_params = [{transform_indices = @transform_0, window_bounds = array<i64: 1, 16, 16>}, {transform_indices = @transform_1, window_bounds = array<i64: 1, 32, 16>}, {transform_indices = @transform_2, window_bounds = array<i64: 1, 32, 16>}, {pipeline_mode = #tpu.pipeline_mode<synchronous>, transform_indices = @transform_3, window_bounds = array<i64: 1, 16, 16>}, {transform_indices = @transform_4, window_bounds = array<i64: 1, 16, 16>}]} {
    %c16_i32 = arith.constant 16 : i32
    %0 = arith.muli %arg1, %c16_i32 : i32
    %1 = tpu.assume_multiple %0, 16 : i32
    %c0 = arith.constant 0 : index
    %c0_0 = arith.constant 0 : index
    %c0_1 = arith.constant 0 : index
    %2 = vector.load %arg2[%c0, %c0_0, %c0_1] : memref<1x16x16xf32, #tpu.memory_space<vmem>>, vector<1x16x16xf32>
    %3 = vector.shape_cast %2 : vector<1x16x16xf32> to vector<16x16xf32>
    %c0_2 = arith.constant 0 : index
    %4 = arith.index_cast %1 : i32 to index
    %c0_3 = arith.constant 0 : index
    %5 = vector.load %arg3[%c0_2, %4, %c0_3] : memref<1x32x16xf32, #tpu.memory_space<vmem>>, vector<1x32x16xf32>
    %6 = vector.shape_cast %5 : vector<1x32x16xf32> to vector<32x16xf32>
    %c0_4 = arith.constant 0 : index
    %7 = arith.index_cast %1 : i32 to index
    %c0_5 = arith.constant 0 : index
    %8 = vector.load %arg4[%c0_4, %7, %c0_5] : memref<1x32x16xf32, #tpu.memory_space<vmem>>, vector<1x32x16xf32>
    %9 = vector.shape_cast %8 : vector<1x32x16xf32> to vector<32x16xf32>
    %c0_6 = arith.constant 0 : index
    %c0_7 = arith.constant 0 : index
    %c0_8 = arith.constant 0 : index
    %10 = vector.load %arg5[%c0_6, %c0_7, %c0_8] : memref<1x16x16xf32, #tpu.memory_space<vmem>>, vector<1x16x16xf32>
    %11 = vector.shape_cast %10 : vector<1x16x16xf32> to vector<16x16xf32>
    %cst = arith.constant dense<0.000000e+00> : vector<16x32xf32>
    %12 = tpu.matmul %3, %6, %cst {dimension_numbers = #tpu.dot_dimension_numbers<[1], [1], [0], [0], [0, 0, 1, 0], [], []>} : vector<16x16xf32>, vector<32x16xf32>, vector<16x32xf32> -> vector<16x32xf32>
    %cst_9 = arith.constant dense<0.000000e+00> : vector<16x16xf32>
    %13 = tpu.matmul %3, %11, %cst_9 {dimension_numbers = #tpu.dot_dimension_numbers<[1], [0], [0], [1], [0, 0, 1, 1], [], []>} : vector<16x16xf32>, vector<16x16xf32>, vector<16x16xf32> -> vector<16x16xf32>
    %cst_10 = arith.constant 0.000000e+00 : f32
    %14 = vector.broadcast %cst_10 : f32 to vector<16x112xf32>
    %15 = tpu.concatenate %13, %14 in 1 : vector<16x16xf32>, vector<16x112xf32> -> vector<16x128xf32>
    %c0_i32 = arith.constant 0 : i32
    %16 = tpu.dynamic_rotate %15 by %c0_i32 dim 1 {stride = 1 : si32, stride_dimension = 0 : si32} : vector<16x128xf32>, i32 -> vector<16x128xf32>
    %17 = vector.extract_strided_slice %16 {offsets = [0, 0], sizes = [16, 32], strides = [1, 1]} : vector<16x128xf32> to vector<16x32xf32>
    %18 = tpu.iota {dimensions = array<i32: 0>} : vector<16x32xi32>
    %19 = tpu.iota {dimensions = array<i32: 1>} : vector<16x32xi32>
    %20 = arith.subi %19, %18 : vector<16x32xi32>
    %c0_i32_11 = arith.constant 0 : i32
    %21 = vector.broadcast %c0_i32_11 : i32 to vector<16x32xi32>
    %22 = arith.cmpi sge, %20, %21 : vector<16x32xi32>
    %c16_i32_12 = arith.constant 16 : i32
    %23 = vector.broadcast %c16_i32_12 : i32 to vector<16x32xi32>
    %24 = arith.cmpi slt, %20, %23 : vector<16x32xi32>
    %25 = arith.andi %22, %24 : vector<16x32xi1>
    %26 = arith.addf %12, %17 : vector<16x32xf32>
    %cst_13 = arith.constant 2.500000e-01 : f32
    %27 = vector.broadcast %cst_13 : f32 to vector<16x32xf32>
    %28 = arith.mulf %26, %27 : vector<16x32xf32>
    %cst_14 = arith.constant -1.000000e+30 : f32
    %29 = vector.broadcast %cst_14 : f32 to vector<16x32xf32>
    %30 = arith.select %25, %28, %29 : vector<16x32xi1>, vector<16x32xf32>
    %cst_15 = arith.constant dense<0xFF800000> : vector<16xf32>
    %31 = vector.multi_reduction <maximumf>, %30, %cst_15 [1] : vector<16x32xf32> to vector<16xf32>
    %32 = vector.shape_cast %31 : vector<16xf32> to vector<16x1xf32>
    %33 = vector.broadcast %32 : vector<16x1xf32> to vector<16x32xf32>
    %34 = arith.subf %30, %33 : vector<16x32xf32>
    %35 = math.exp %34 : vector<16x32xf32>
    %cst_16 = arith.constant dense<0.000000e+00> : vector<16xf32>
    %36 = vector.multi_reduction <add>, %35, %cst_16 [1] : vector<16x32xf32> to vector<16xf32>
    %37 = vector.shape_cast %36 : vector<16xf32> to vector<16x1xf32>
    %38 = tpu.reciprocal %37 : vector<16x1xf32> -> vector<16x1xf32>
    %39 = vector.broadcast %38 : vector<16x1xf32> to vector<16x32xf32>
    %40 = arith.mulf %35, %39 : vector<16x32xf32>
    %cst_17 = arith.constant dense<0.000000e+00> : vector<16x16xf32>
    %41 = tpu.matmul %40, %9, %cst_17 {dimension_numbers = #tpu.dot_dimension_numbers<[1], [0], [0], [1], [0, 0, 1, 1], [], []>} : vector<16x32xf32>, vector<32x16xf32>, vector<16x16xf32> -> vector<16x16xf32>
    %c0_18 = arith.constant 0 : index
    %c0_19 = arith.constant 0 : index
    %c0_20 = arith.constant 0 : index
    %42 = vector.load %arg6[%c0_18, %c0_19, %c0_20] : memref<1x16x16xf32, #tpu.memory_space<vmem>>, vector<1x16x16xf32>
    %43 = vector.shape_cast %42 : vector<1x16x16xf32> to vector<16x16xf32>
    %44 = vector.shape_cast %41 : vector<16x16xf32> to vector<1x16x16xf32>
    tpu.vector_store %arg6[%c0_18, %c0_19, %c0_20], %44 {strides = array<i32>} : memref<1x16x16xf32, #tpu.memory_space<vmem>>, vector<1x16x16xf32>,
    return
  }
  func.func @transform_0(%arg0: i32, %arg1: i32) -> (i32, i32, i32) {
    %c0_i32 = arith.constant 0 : i32
    %c0_i32_0 = arith.constant 0 : i32
    return %arg0, %arg1, %c0_i32 : i32, i32, i32
  }
  func.func @transform_1(%arg0: i32, %arg1: i32) -> (i32, i32, i32) {
    %c0_i32 = arith.constant 0 : i32
    %c0_i32_0 = arith.constant 0 : i32
    %c0_i32_1 = arith.constant 0 : i32
    return %arg0, %c0_i32, %c0_i32_0 : i32, i32, i32
  }
  func.func @transform_2(%arg0: i32, %arg1: i32) -> (i32, i32, i32) {
    %c0_i32 = arith.constant 0 : i32
    %c0_i32_0 = arith.constant 0 : i32
    %c0_i32_1 = arith.constant 0 : i32
    return %arg0, %c0_i32, %c0_i32_0 : i32, i32, i32
  }
  func.func @transform_3(%arg0: i32, %arg1: i32) -> (i32, i32, i32) {
    %c0_i32 = arith.constant 0 : i32
    %c0_i32_0 = arith.constant 0 : i32
    %c0_i32_1 = arith.constant 0 : i32
    %c0_i32_2 = arith.constant 0 : i32
    return %c0_i32, %c0_i32_0, %c0_i32_1 : i32, i32, i32
  }
  func.func @transform_4(%arg0: i32, %arg1: i32) -> (i32, i32, i32) {
    %c0_i32 = arith.constant 0 : i32
    %c0_i32_0 = arith.constant 0 : i32
    return %arg0, %arg1, %c0_i32 : i32, i32, i32
  }
}

module attributes {stable_mosaic.version = 11 : i64} {
  func.func @_seq_attention_kernel(%arg0: i32, %arg1: i32, %arg2: memref<1x16x16xf32, #tpu.memory_space<vmem>>, %arg3: memref<1x32x16xf32, #tpu.memory_space<vmem>>, %arg4: memref<1x32x16xf32, #tpu.memory_space<vmem>>, %arg5: memref<1x16x16xf32, #tpu.memory_space<vmem>>, %arg6: memref<1x16x16xf32, #tpu.memory_space<vmem>>) attributes {dimension_semantics = [#tpu.dimension_semantics<parallel>, #tpu.dimension_semantics<parallel>], iteration_bounds = array<i64: 2, 1>, scalar_prefetch = 0 : i64, scratch_operands = 0 : i64, tpu.core_type = #tpu.core_type<tc>, window_params = [{transform_indices = @transform_0, window_bounds = array<i64: 1, 16, 16>}, {transform_indices = @transform_1, window_bounds = array<i64: 1, 32, 16>}, {transform_indices = @transform_2, window_bounds = array<i64: 1, 32, 16>}, {pipeline_mode = #tpu.pipeline_mode<synchronous>, transform_indices = @transform_3, window_bounds = array<i64: 1, 16, 16>}, {transform_indices = @transform_4, window_bounds = array<i64: 1, 16, 16>}]} {
    %c16_i32 = arith.constant 16 : i32
    %0 = arith.muli %arg1, %c16_i32 : i32
    %1 = tpu.assume_multiple %0, 16 : i32
    %c0 = arith.constant 0 : index
    %c0_0 = arith.constant 0 : index
    %c0_1 = arith.constant 0 : index
    %2 = vector.load %arg2[%c0, %c0_0, %c0_1] : memref<1x16x16xf32, #tpu.memory_space<vmem>>, vector<1x16x16xf32>
    %3 = vector.shape_cast %2 : vector<1x16x16xf32> to vector<16x16xf32>
    %c0_2 = arith.constant 0 : index
    %4 = arith.index_cast %1 : i32 to index
    %c0_3 = arith.constant 0 : index
    %5 = vector.load %arg3[%c0_2, %4, %c0_3] : memref<1x32x16xf32, #tpu.memory_space<vmem>>, vector<1x32x16xf32>
    %6 = vector.shape_cast %5 : vector<1x32x16xf32> to vector<32x16xf32>
    %c0_4 = arith.constant 0 : index
    %7 = arith.index_cast %1 : i32 to index
    %c0_5 = arith.constant 0 : index
    %8 = vector.load %arg4[%c0_4, %7, %c0_5] : memref<1x32x16xf32, #tpu.memory_space<vmem>>, vector<1x32x16xf32>
    %9 = vector.shape_cast %8 : vector<1x32x16xf32> to vector<32x16xf32>
    %c0_6 = arith.constant 0 : index
    %c0_7 = arith.constant 0 : index
    %c0_8 = arith.constant 0 : index
    %10 = vector.load %arg5[%c0_6, %c0_7, %c0_8] : memref<1x16x16xf32, #tpu.memory_space<vmem>>, vector<1x16x16xf32>
    %11 = vector.shape_cast %10 : vector<1x16x16xf32> to vector<16x16xf32>
    %cst = arith.constant dense<0.000000e+00> : vector<16x32xf32>
    %12 = tpu.matmul %3, %6, %cst {dimension_numbers = #tpu.dot_dimension_numbers<[1], [1], [0], [0], [0, 0, 1, 0], [], []>} : vector<16x16xf32>, vector<32x16xf32>, vector<16x32xf32> -> vector<16x32xf32>
    %cst_9 = arith.constant dense<0.000000e+00> : vector<16x16xf32>
    %13 = tpu.matmul %3, %11, %cst_9 {dimension_numbers = #tpu.dot_dimension_numbers<[1], [0], [0], [1], [0, 0, 1, 1], [], []>} : vector<16x16xf32>, vector<16x16xf32>, vector<16x16xf32> -> vector<16x16xf32>
    %cst_10 = arith.constant 0.000000e+00 : f32
    %14 = vector.broadcast %cst_10 : f32 to vector<16x16xf32>
    %15 = tpu.concatenate %13, %14 in 1 : vector<16x16xf32>, vector<16x16xf32> -> vector<16x32xf32>
    %16 = tpu.iota {dimensions = array<i32: 0>} : vector<16x32xi32>
    %cst_11 = arith.constant 0.000000e+00 : f32
    %17 = vector.broadcast %cst_11 : f32 to vector<16x1xf32>
    %18 = vector.extract_strided_slice %15 {offsets = [0, 0], sizes = [16, 31], strides = [1, 1]} : vector<16x32xf32> to vector<16x31xf32>
    %19 = tpu.concatenate %17, %18 in 1 : vector<16x1xf32>, vector<16x31xf32> -> vector<16x32xf32>
    %c0_i32 = arith.constant 0 : i32
    %20 = vector.broadcast %c0_i32 : i32 to vector<16x32xi32>
    %21 = arith.shrsi %16, %20 : vector<16x32xi32>
    %c1_i32 = arith.constant 1 : i32
    %22 = vector.broadcast %c1_i32 : i32 to vector<16x32xi32>
    %23 = arith.andi %21, %22 : vector<16x32xi32>
    %c1_i32_12 = arith.constant 1 : i32
    %24 = vector.broadcast %c1_i32_12 : i32 to vector<16x32xi32>
    %25 = arith.cmpi eq, %23, %24 : vector<16x32xi32>
    %26 = arith.select %25, %19, %15 : vector<16x32xi1>, vector<16x32xf32>
    %cst_13 = arith.constant 0.000000e+00 : f32
    %27 = vector.broadcast %cst_13 : f32 to vector<16x2xf32>
    %28 = vector.extract_strided_slice %26 {offsets = [0, 0], sizes = [16, 30], strides = [1, 1]} : vector<16x32xf32> to vector<16x30xf32>
    %29 = tpu.concatenate %27, %28 in 1 : vector<16x2xf32>, vector<16x30xf32> -> vector<16x32xf32>
    %c1_i32_14 = arith.constant 1 : i32
    %30 = vector.broadcast %c1_i32_14 : i32 to vector<16x32xi32>
    %31 = arith.shrsi %16, %30 : vector<16x32xi32>
    %c1_i32_15 = arith.constant 1 : i32
    %32 = vector.broadcast %c1_i32_15 : i32 to vector<16x32xi32>
    %33 = arith.andi %31, %32 : vector<16x32xi32>
    %c1_i32_16 = arith.constant 1 : i32
    %34 = vector.broadcast %c1_i32_16 : i32 to vector<16x32xi32>
    %35 = arith.cmpi eq, %33, %34 : vector<16x32xi32>
    %36 = arith.select %35, %29, %26 : vector<16x32xi1>, vector<16x32xf32>
    %cst_17 = arith.constant 0.000000e+00 : f32
    %37 = vector.broadcast %cst_17 : f32 to vector<16x4xf32>
    %38 = vector.extract_strided_slice %36 {offsets = [0, 0], sizes = [16, 28], strides = [1, 1]} : vector<16x32xf32> to vector<16x28xf32>
    %39 = tpu.concatenate %37, %38 in 1 : vector<16x4xf32>, vector<16x28xf32> -> vector<16x32xf32>
    %c2_i32 = arith.constant 2 : i32
    %40 = vector.broadcast %c2_i32 : i32 to vector<16x32xi32>
    %41 = arith.shrsi %16, %40 : vector<16x32xi32>
    %c1_i32_18 = arith.constant 1 : i32
    %42 = vector.broadcast %c1_i32_18 : i32 to vector<16x32xi32>
    %43 = arith.andi %41, %42 : vector<16x32xi32>
    %c1_i32_19 = arith.constant 1 : i32
    %44 = vector.broadcast %c1_i32_19 : i32 to vector<16x32xi32>
    %45 = arith.cmpi eq, %43, %44 : vector<16x32xi32>
    %46 = arith.select %45, %39, %36 : vector<16x32xi1>, vector<16x32xf32>
    %cst_20 = arith.constant 0.000000e+00 : f32
    %47 = vector.broadcast %cst_20 : f32 to vector<16x8xf32>
    %48 = vector.extract_strided_slice %46 {offsets = [0, 0], sizes = [16, 24], strides = [1, 1]} : vector<16x32xf32> to vector<16x24xf32>
    %49 = tpu.concatenate %47, %48 in 1 : vector<16x8xf32>, vector<16x24xf32> -> vector<16x32xf32>
    %c3_i32 = arith.constant 3 : i32
    %50 = vector.broadcast %c3_i32 : i32 to vector<16x32xi32>
    %51 = arith.shrsi %16, %50 : vector<16x32xi32>
    %c1_i32_21 = arith.constant 1 : i32
    %52 = vector.broadcast %c1_i32_21 : i32 to vector<16x32xi32>
    %53 = arith.andi %51, %52 : vector<16x32xi32>
    %c1_i32_22 = arith.constant 1 : i32
    %54 = vector.broadcast %c1_i32_22 : i32 to vector<16x32xi32>
    %55 = arith.cmpi eq, %53, %54 : vector<16x32xi32>
    %56 = arith.select %55, %49, %46 : vector<16x32xi1>, vector<16x32xf32>
    %57 = tpu.iota {dimensions = array<i32: 0>} : vector<16x32xi32>
    %58 = tpu.iota {dimensions = array<i32: 1>} : vector<16x32xi32>
    %59 = arith.subi %58, %57 : vector<16x32xi32>
    %c0_i32_23 = arith.constant 0 : i32
    %60 = vector.broadcast %c0_i32_23 : i32 to vector<16x32xi32>
    %61 = arith.cmpi sge, %59, %60 : vector<16x32xi32>
    %c16_i32_24 = arith.constant 16 : i32
    %62 = vector.broadcast %c16_i32_24 : i32 to vector<16x32xi32>
    %63 = arith.cmpi slt, %59, %62 : vector<16x32xi32>
    %64 = arith.andi %61, %63 : vector<16x32xi1>
    %65 = arith.addf %12, %56 : vector<16x32xf32>
    %cst_25 = arith.constant 2.500000e-01 : f32
    %66 = vector.broadcast %cst_25 : f32 to vector<16x32xf32>
    %67 = arith.mulf %65, %66 : vector<16x32xf32>
    %cst_26 = arith.constant -1.000000e+30 : f32
    %68 = vector.broadcast %cst_26 : f32 to vector<16x32xf32>
    %69 = arith.select %64, %67, %68 : vector<16x32xi1>, vector<16x32xf32>
    %cst_27 = arith.constant dense<0xFF800000> : vector<16xf32>
    %70 = vector.multi_reduction <maximumf>, %69, %cst_27 [1] : vector<16x32xf32> to vector<16xf32>
    %71 = vector.shape_cast %70 : vector<16xf32> to vector<16x1xf32>
    %72 = vector.broadcast %71 : vector<16x1xf32> to vector<16x32xf32>
    %73 = arith.subf %69, %72 : vector<16x32xf32>
    %74 = math.exp %73 : vector<16x32xf32>
    %cst_28 = arith.constant dense<0.000000e+00> : vector<16xf32>
    %75 = vector.multi_reduction <add>, %74, %cst_28 [1] : vector<16x32xf32> to vector<16xf32>
    %76 = vector.shape_cast %75 : vector<16xf32> to vector<16x1xf32>
    %77 = tpu.reciprocal %76 : vector<16x1xf32> -> vector<16x1xf32>
    %78 = vector.broadcast %77 : vector<16x1xf32> to vector<16x32xf32>
    %79 = arith.mulf %74, %78 : vector<16x32xf32>
    %cst_29 = arith.constant dense<0.000000e+00> : vector<16x16xf32>
    %80 = tpu.matmul %79, %9, %cst_29 {dimension_numbers = #tpu.dot_dimension_numbers<[1], [0], [0], [1], [0, 0, 1, 1], [], []>} : vector<16x32xf32>, vector<32x16xf32>, vector<16x16xf32> -> vector<16x16xf32>
    %c0_30 = arith.constant 0 : index
    %c0_31 = arith.constant 0 : index
    %c0_32 = arith.constant 0 : index
    %81 = vector.load %arg6[%c0_30, %c0_31, %c0_32] : memref<1x16x16xf32, #tpu.memory_space<vmem>>, vector<1x16x16xf32>
    %82 = vector.shape_cast %81 : vector<1x16x16xf32> to vector<16x16xf32>
    %83 = vector.shape_cast %80 : vector<16x16xf32> to vector<1x16x16xf32>
    tpu.vector_store %arg6[%c0_30, %c0_31, %c0_32], %83 {strides = array<i32>} : memref<1x16x16xf32, #tpu.memory_space<vmem>>, vector<1x16x16xf32>,
    return
  }
  func.func @transform_0(%arg0: i32, %arg1: i32) -> (i32, i32, i32) {
    %c0_i32 = arith.constant 0 : i32
    %c0_i32_0 = arith.constant 0 : i32
    return %arg0, %arg1, %c0_i32 : i32, i32, i32
  }
  func.func @transform_1(%arg0: i32, %arg1: i32) -> (i32, i32, i32) {
    %c0_i32 = arith.constant 0 : i32
    %c0_i32_0 = arith.constant 0 : i32
    %c0_i32_1 = arith.constant 0 : i32
    return %arg0, %c0_i32, %c0_i32_0 : i32, i32, i32
  }
  func.func @transform_2(%arg0: i32, %arg1: i32) -> (i32, i32, i32) {
    %c0_i32 = arith.constant 0 : i32
    %c0_i32_0 = arith.constant 0 : i32
    %c0_i32_1 = arith.constant 0 : i32
    return %arg0, %c0_i32, %c0_i32_0 : i32, i32, i32
  }
  func.func @transform_3(%arg0: i32, %arg1: i32) -> (i32, i32, i32) {
    %c0_i32 = arith.constant 0 : i32
    %c0_i32_0 = arith.constant 0 : i32
    %c0_i32_1 = arith.constant 0 : i32
    %c0_i32_2 = arith.constant 0 : i32
    return %c0_i32, %c0_i32_0, %c0_i32_1 : i32, i32, i32
  }
  func.func @transform_4(%arg0: i32, %arg1: i32) -> (i32, i32, i32) {
    %c0_i32 = arith.constant 0 : i32
    %c0_i32_0 = arith.constant 0 : i32
    return %arg0, %arg1, %c0_i32 : i32, i32, i32
  }
}

</mosaic_0001>

<bundles_post_ra>
// kernel: tpu_custom_call.1
= control target key start
LH: loop header
LB: loop body
LE: loop exit
PB: predicated region body
PF: predicated region fallthrough
CT: control target
= control target key end

     0   :  { %9 = vsyncpa [#allocation3], 0  ;;  %s1113_s0 = inlined_call_operand.vmem [shape: f32[2,16,16], index: 0, kind: input, shape index: {}]   ;;  %s1114_s1 = inlined_call_operand.vmem [shape: f32[2,32,16], index: 1, kind: input, shape index: {}]   ;;  %s1115_s2 = inlined_call_operand.vmem [shape: f32[2,32,16], index: 2, kind: input, shape index: {}]   ;;  %s1116_s3 = inlined_call_operand.vmem [shape: f32[1,16,16], index: 3, kind: input, shape index: {}]   ;;  %s1117_s4 = inlined_call_operand.hbm [shape: f32[2,16,16], index: 4, kind: output, shape index: {}]  }
   0x1   :  { %11 = vsyncpa [#allocation3 + $0x1], 0  ;;  %s957_s15 = smov 0   ;;  %s959_s16 = smov 0  }
   0x2   :  { %s961_s17 = smov 0   ;;  %s963_s18 = smov 0  }
   0x3   :  { %s965_s19 = smov 0   ;;  %s967_s20 = smov 0  }
   0x4 LB: > { %s706_s21 = sadd.s32 4294967295, %s925_s20   ;;  %s707_s22 = sadd.s32 4294967294, %s925_s20   ;;  %s925_s20 = sphi %s967_s20, %s17_s20   ;;  %s921_s19 = sphi %s965_s19, %s1124_s19   ;;  %s917_s18 = sphi %s963_s18, %s1123_s18   ;;  %s913_s17 = sphi %s961_s17, %s1122_s17   ;;  %s909_s16 = sphi %s959_s16, %s1121_s16   ;;  %s905_s15 = sphi %s957_s15, %s1120_s15  }
   0x5   : > { %s29_s23 = sadd.s32 1, %s921_s19  ;;  %s139_s24 = sadd.s32 1, %s913_s17 }
   0x6   : > { %p31_p0 = scmp.ge.s32.totalorder %s29_s23, 2  ;;  %p149_p1 = scmp.ne.s32.totalorder %s913_s17, %s909_s16 }
   0x7   : > { %p150_p2 = scmp.eq.s32.totalorder %s706_s21, 1  ;;  %p155_p3 = scmp.ne.s32.totalorder %s909_s16, %s905_s15 }
   0x8   : > { %s1126_s23 = smov (%p31_p0, %s29_s23), 0  ;;  %p156_p5 = scmp.eq.s32.totalorder %s707_s22, 1 }
   0x9   : > { %p997_p4 = por %p150_p2, %p149_p1  ;;  %s134_s26 = ssub.s32 %s921_s19, %s1126_s23 }
   0xa   : > { %p710_p6 = scmp.ge.s32.totalorder %s925_s20, 1  ;;  %p137_p7 = scmp.eq.s32.totalorder %s134_s26, 0 }
   0xb   : > { %p1004_p8 = por %p156_p5, %p155_p3  ;;  %p206_p9 = scmp.lt.s32.totalorder %s925_s20, 3 }
   0xc   : > { %s1010_s28 = scalar_select %p137_p7, %s913_s17, %s139_s24  }
   0xd   : > { %p207_p10 = pnand %p710_p6, %p206_p9 }
   0xe   : > { %p247_p11 = scmp.lt.s32.totalorder (!%p207_p10), %s917_s18, 1  ;;  %s927_s22 = smov (!%p207_p10), 256  }
   0xf   : > { %210 = sbr.rel (%p207_p10) target bundleno = 867 (0x363), region = 36  ;;  %s928_s24 = smov (!%p207_p10), 264  }
  0x10   : > { %s243_s5 = sand.u32 (!%p207_p10), 1, %s909_s16  }
  0x11   : > { %s711_s6 = sshll.u32 (!%p207_p10), %s243_s5, 4  ;;  %s1068_s13 = scalar_lea.sflag (!%p207_p10), [#allocation3], %s243_s5 }
  0x14   : > { %v281_v0 = vld [vmem:[%s1116_s3 + $0x8] sm:$0xff]  ;;  %v280_v1 = vld [vmem:[%s1116_s3] sm:$0xff]  ;;  %s1020_s7 = scalar_select %p247_p11, %s917_s18, 1  ;;  %vm282_vm0 = vcmask 130048   ;;  %v373_v12 = vlaneseq  ;;  %vm477_vm4 = vcmask 261120  }
  0x15   : > { %753 = vmatprep.subr.mxu0 %v281_v0 }
  0x16   : > { %754 = vmatpush3.msra.mxu0 %v281_v0  ;;  %s733_s8 = sshll.u32 %s1020_s7, 4  ;;  %s734_s9 = sshll.u32 %s1020_s7, 5  ;;  %v374_v13 = vshrl.u32 %v373_v12, 7  ;;  %v377_v14 = vand.u32 127, %v373_v12 }
  0x17   : > { %755 = vmatprep.subr.mxu0 %v280_v1  ;;  %s254_s12 = scalar_lea.vmem %s1113_s0, %s733_s8  ;;  %s260_s21 = scalar_lea.vmem %s1114_s1, %s734_s9 }
  0x18   : > { %756 = vmatpush3.msra.mxu0 %v280_v1  ;;  %v268_v2 = vld [vmem:[%s254_s12] sm:$0xff]  ;;  %v269_v3 = vld [vmem:[%s254_s12 + $0x8] sm:$0xff]  ;;  %v274_v4 = vld [vmem:[%s260_s21 + $0x18] sm:$0xff]  ;;  %v378_v15 = vsub.s32 %v377_v14, %v374_v13  ;;  %v375_v16 = vadd.s32 8, %v374_v13  ;;  %s265_s30 = scalar_lea.vmem %s1115_s2, %s734_s9  ;;  %s245_s7 = scalar_lea.vmem [#allocation2], %s711_s6 }
  0x19   : > { %757 = vmatprep.mubr.msk.f32.mxu0 %vm282_vm0, %v268_v2  ;;  %760 = vmatprep.subr.msk.mxu1 %vm282_vm0, %v274_v4  ;;  %v273_v5 = vld [vmem:[%s260_s21 + $0x10] sm:$0xff]  ;;  %v272_v6 = vld [vmem:[%s260_s21 + $0x8] sm:$0xff]  ;;  %v271_v7 = vld [vmem:[%s260_s21] sm:$0xff]  ;;  %s599_s8 = sshll.u32 %s245_s7, 4  ;;  %s736_s9 = sshll.u32 %s917_s18, 8  ;;  %s1059_s8 = int_to_ptr.vmem [resolvable:$true] %s599_s8 }
  0x1a   : > { %758 = vmatmul.mubr.msk.f32.vlgmr.msra.gmra.mxu0 %vm282_vm0, %v269_v3  ;;  %761 = vmatpush3.xpose.msk.msra.mxu1 %vm282_vm0, %v274_v4  ;;  %vm380_vm1 = vcmp.ge.s32.totalorder %v378_v15, 0  ;;  %vm382_vm2 = vcmp.lt.s32.totalorder %v378_v15, 16  ;;  %v379_v18 = vsub.s32 %v377_v14, %v375_v16  ;;  %v279_v40 = vld [vmem:[%s265_s30 + $0x18] sm:$0xff]  ;;  %v278_v41 = vld [vmem:[%s265_s30 + $0x10] sm:$0xff]  ;;  %v277_v42 = vld [vmem:[%s265_s30 + $0x8] sm:$0xff]  ;;  %s1064_s12 = scalar_lea.hbm %s1117_s4, %s736_s9  ;;  %s849_s14 = scalar_lea.vmem %s1059_s8, 256 }
  0x1b   : > { %762 = vmatprep.subr.msk.mxu1 %vm282_vm0, %v273_v5  ;;  %768 = vmatprep.mubr.msk.f32.mxu1 %vm282_vm0, %v268_v2  ;;  %vm384_vm3 = vmand %vm380_vm1, %vm382_vm2  ;;  %v276_v43 = vld [vmem:[%s265_s30] sm:$0xff]  ;;  %p850_p12 = scmp.ne.s32.totalorder %s1059_s8, %s849_s14  ;;  %s929_s18 = smov [#allocation2]  }
  0x1c   : > { %vm381_vm5 = vcmp.ge.s32.totalorder %v379_v18, 0  ;;  %vm383_vm6 = vcmp.lt.s32.totalorder %v379_v18, 16  ;;  %771 = vmatprep.subr.mxu0 %v279_v40  ;;  %s853_s21 = sshll.u32 %s929_s18, 4  ;;  %s854_s21 = int_to_ptr.vmem [resolvable:$false] %s853_s21 }
  0x1d   : > { %vm385_vm7 = vmand %vm381_vm5, %vm383_vm6  ;;  %772 = vmatpush3.msra.mxu0 %v279_v40  ;;  %p851_p13 = pnand %p850_p12, %p997_p4  ;;  %p856_p1 = scmp.lt.s32.totalorder %s1059_s8, %s854_s21 }
  0x1e   : > { %763 = vmatpush3.xpose.msk.msra.mxu1 %vm282_vm0, %v273_v5  ;;  %773 = vmatprep.subr.mxu0 %v278_v41 }
  0x1f   : > { %764 = vmatprep.subr.msk.mxu1 %vm282_vm0, %v272_v6  ;;  %774 = vmatpush3.msra.mxu0 %v278_v41  ;;  %p852_p0 = pneg %p851_p13 }
  0x20   : > { %775 = vmatprep.subr.mxu0 %v277_v42 }
  0x21   : > { %776 = vmatpush3.msra.mxu0 %v277_v42 }
  0x22   : > { %765 = vmatpush3.xpose.msk.msra.mxu1 %vm282_vm0, %v272_v6  ;;  %777 = vmatprep.subr.mxu0 %v276_v43 }
  0x23   : > { %766 = vmatprep.subr.msk.mxu1 %vm282_vm0, %v271_v7  ;;  %778 = vmatpush3.msra.mxu0 %v276_v43 }
  0x26   : > { %767 = vmatpush3.xpose.msk.msra.mxu1 %vm282_vm0, %v271_v7 }
  0x29   : > { %769 = vmatmul.mubr.msk.f32.vlgmr.msra.gmra.mxu1 %vm282_vm0, %v269_v3 }
  0xda   : > { %v759_v8 = vpop.f32.mrf.mxu0 }
  0xdb   : > { %v365_v11 = vsel %vm282_vm0, %v759_v8, 0.0 }
  0xdc   : > { %v355_v9 = vpop.f32.mrf.mxu0 }
  0xdd   : > { %v364_v10 = vsel %vm282_vm0, %v355_v9, 0.0 }
  0xde   : > { %367 = vrot.lane.b32.xlu0 %v364_v10, %s927_s22  ;;  %s855_s22 = scalar_lea.vmem %s854_s21, 512 }
  0xdf   : > { %p857_p2 = scmp.lt.s32.totalorder %s855_s22, %s849_s14 }
  0xe1   : > { %p858_p3 = por %p857_p2, %p856_p1 }
  0xe2   : > { %371 = vrot.lane.b32.xlu0 %v365_v11, %s928_s24 }
  0xe3   : > { %p859_p5 = pnand %p858_p3, %p852_p0 }
  0xe9   : > { %v770_v17 = vpop.f32.mrf.mxu1 }
  0xeb   : > { %v464_v19 = vpop.f32.mrf.mxu1 }
 0x150   : > { %v368_v20 = vpop.permute.xlu0 %367 }
 0x151   : > { %v465_v21 = vadd.f32 %v464_v19, %v368_v20 }
 0x153   : > { %v473_v22 = vmul.f32 0.25, %v465_v21 }
 0x154   : > { %v372_v23 = vpop.permute.xlu0 %371 }
 0x155   : > { %v470_v24 = vadd.f32 %v770_v17, %v372_v23  ;;  %v475_v25 = vsel %vm384_vm3, %v473_v22, -1e+30 }
 0x156   : > { %v478_v26 = vsel %vm477_vm4, %v475_v25, -inf }
 0x157   : > { %v474_v27 = vmul.f32 0.25, %v470_v24  ;;  %479 = vmax.xlane.f32.xlu1 %v478_v26 }
 0x159   : > { %v476_v28 = vsel %vm385_vm7, %v474_v27, -1e+30 }
 0x15a   : > { %v481_v29 = vsel %vm477_vm4, %v476_v28, -inf }
 0x15b   : > { %482 = vmax.xlane.f32.xlu1 %v481_v29 }
 0x1e0   : > { %v480_v30 = vpop.xlane.xlu1 %479 }
 0x1e1   : > { %v484_v31 = vsub.f32 %v475_v25, %v480_v30 }
 0x1e3   : > { %v486_v32 = vmul.f32 1.442695, %v484_v31 }
 0x1e4   : > { %v483_v33 = vpop.xlane.xlu1 %482 }
 0x1e5   : > { %841 = vpow2.f32 %v486_v32  ;;  %v485_v34 = vsub.f32 %v476_v28, %v483_v33 }
 0x1e7   : > { %v488_v35 = vmul.f32 1.442695, %v485_v34 }
 0x1e9   : > { %843 = vpow2.f32 %v488_v35 }
 0x1f2   : > { %v842_v36 = vpop.eup %841 }
 0x1f3   : > { %v490_v37 = vsel %vm477_vm4, %v842_v36, 0.0 }
 0x1f4   : > { %491 = vadd.xlane.f32.xlu0 %v490_v37 }
 0x1f6   : > { %v844_v38 = vpop.eup %843 }
 0x1f7   : > { %v493_v39 = vsel %vm477_vm4, %v844_v38, 0.0 }
 0x1f8   : > { %494 = vadd.xlane.f32.xlu1 %v493_v39 }
 0x27d   : > { %v492_v44 = vpop.xlane.xlu0 %491 }
 0x27e   : > { %845 = vrcp.f32 %v492_v44 }
 0x281   : > { %v495_v45 = vpop.xlane.xlu1 %494 }
 0x282   : > { %847 = vrcp.f32 %v495_v45 }
 0x28b   : > { %v846_v46 = vpop.eup %845 }
 0x28c   : > { %v498_v47 = vmul.f32 %v846_v46, %v842_v36 }
 0x28e   : > { %779 = vmatprep.mubr.msk.f32.mxu0 %vm477_vm4, %v498_v47 }
 0x28f   : > { %v848_v48 = vpop.eup %847 }
 0x290   : > { %v499_v49 = vmul.f32 %v848_v48, %v844_v38 }
 0x292   : > { %780 = vmatmul.mubr.msk.f32.vlgmr.msra.gmra.mxu0 %vm477_vm4, %v499_v49 }
 0x352   : > { %v781_v50 = vpop.f32.mrf.mxu0 }
 0x353   : > { %582 = vst.msk [vmem:[%s245_s7 + $0x8] sm:$0xff] %vm282_vm0, %v781_v50 }
 0x354   : > { %v572_v51 = vpop.f32.mrf.mxu0 }
 0x355   : > { %581 = vst.msk [vmem:[%s245_s7] sm:$0xff] %vm282_vm0, %v572_v51 }
 0x356   : > { %862 = shalt.err (!%p859_p5)
}
 0x357   : > { %s863_s24 = scalar_lea.hbm %s1064_s12, 256  ;;  %s867_s30 = scalar_lea.hbm %s1117_s4, 512 }
 0x358   : > { %p864_p6 = scmp.ne.s32.totalorder %s1064_s12, %s863_s24  ;;  %p868_p10 = scmp.lt.s32.totalorder %s1064_s12, %s1117_s4 }
 0x359   : > { %p869_p11 = scmp.lt.s32.totalorder %s867_s30, %s863_s24 }
 0x35a   : > { %p865_p7 = pnand %p864_p6, %p997_p4 }
 0x35b   : > { %p870_p12 = por %p869_p11, %p868_p10 }
 0x35c   : > { %p866_p9 = pneg %p865_p7 }
 0x35e   : > { %p871_p13 = pnand %p870_p12, %p866_p9 }
 0x360   : > { %874 = shalt.err (!%p871_p13)
}
 0x361   : > { %s930_s7 = smov 128   ;;  %s931_s9 = smov 8  }
 0x362   : > { %782 = dma.vmem_to_hbm [thread:$0]  (%p997_p4), %s1059_s8, 256, %s1064_s12, %s1068_s13, %s930_s7, %s930_s7, %s931_s9  }
 0x363 PF: > { %p788_p0 = scmp.ge.s32.totalorder %s925_s20, 2  ;;  %s614_s10 = sand.u32 1, %s905_s15  }
 0x364   : > { %s615_s11 = scalar_lea.sflag [#allocation3], %s614_s10 }
 0x365   : > { %p785_p1 = pnand %p788_p0, %p1004_p8 }
 0x367   : > { %p786_p2 = pneg %p785_p1 }
 0x369   : > { %900 = dma.done.wait (%p786_p2), %s615_s11, 256  }
 0x36a   : > { %902 = vsyncadd (%p786_p2), %s615_s11, 4294967040  ;;  %s17_s20 = sadd.s32 1, %s925_s20   ;;  %s1120_s15 = smov %s909_s16 }
 0x36b   : > { %p14_p3 = scmp.ge.s32.totalorder %s17_s20, 4   ;;  %s1121_s16 = smov %s913_s17 }
 0x36c   : > { %s1122_s17 = smov %s1010_s28  ;;  %s1123_s18 = smov %s921_s19 }
 0x36d   : > { %s1124_s19 = smov %s1126_s23  ;;  %16 = sbr.rel (!%p14_p3) target bundleno = 4 (0x4), region = 79 }
 0x372   :  { %620 = vsyncpa [#allocation3], 1 }
 0x373   :  { %622 = vsyncpa [#allocation3 + $0x1], 1 }

// kernel: tpu_custom_call.1
= control target key start
LH: loop header
LB: loop body
LE: loop exit
PB: predicated region body
PF: predicated region fallthrough
CT: control target
= control target key end

     0   :  { %9 = vsyncpa [#allocation3], 0  ;;  %s1204_s0 = inlined_call_operand.vmem [shape: f32[2,16,16], index: 0, kind: input, shape index: {}]   ;;  %s1205_s1 = inlined_call_operand.vmem [shape: f32[2,32,16], index: 1, kind: input, shape index: {}]   ;;  %s1206_s2 = inlined_call_operand.vmem [shape: f32[2,32,16], index: 2, kind: input, shape index: {}]   ;;  %s1207_s3 = inlined_call_operand.vmem [shape: f32[1,16,16], index: 3, kind: input, shape index: {}]   ;;  %s1208_s4 = inlined_call_operand.hbm [shape: f32[2,16,16], index: 4, kind: output, shape index: {}]  }
   0x1   :  { %11 = vsyncpa [#allocation3 + $0x1], 0  ;;  %s1026_s15 = smov 0   ;;  %s1028_s16 = smov 0  }
   0x2   :  { %s1030_s17 = smov 0   ;;  %s1032_s18 = smov 0  }
   0x3   :  { %s1034_s19 = smov 0   ;;  %s1036_s20 = smov 0  }
   0x4 LB: > { %s773_s21 = sadd.s32 4294967295, %s993_s20   ;;  %s774_s22 = sadd.s32 4294967294, %s993_s20   ;;  %s993_s20 = sphi %s1036_s20, %s17_s20   ;;  %s989_s19 = sphi %s1034_s19, %s1215_s19   ;;  %s985_s18 = sphi %s1032_s18, %s1214_s18   ;;  %s981_s17 = sphi %s1030_s17, %s1213_s17   ;;  %s977_s16 = sphi %s1028_s16, %s1212_s16   ;;  %s973_s15 = sphi %s1026_s15, %s1211_s15  }
   0x5   : > { %s29_s23 = sadd.s32 1, %s989_s19  ;;  %s139_s24 = sadd.s32 1, %s981_s17 }
   0x6   : > { %p31_p0 = scmp.ge.s32.totalorder %s29_s23, 2  ;;  %p149_p1 = scmp.ne.s32.totalorder %s981_s17, %s977_s16 }
   0x7   : > { %p150_p2 = scmp.eq.s32.totalorder %s773_s21, 1  ;;  %p155_p3 = scmp.ne.s32.totalorder %s977_s16, %s973_s15 }
   0x8   : > { %s1217_s23 = smov (%p31_p0, %s29_s23), 0  ;;  %p156_p5 = scmp.eq.s32.totalorder %s774_s22, 1 }
   0x9   : > { %p1066_p4 = por %p150_p2, %p149_p1  ;;  %s134_s26 = ssub.s32 %s989_s19, %s1217_s23 }
   0xa   : > { %p777_p6 = scmp.ge.s32.totalorder %s993_s20, 1  ;;  %p137_p7 = scmp.eq.s32.totalorder %s134_s26, 0 }
   0xb   : > { %p1073_p8 = por %p156_p5, %p155_p3  ;;  %p206_p9 = scmp.lt.s32.totalorder %s993_s20, 3 }
   0xc   : > { %s1079_s28 = scalar_select %p137_p7, %s981_s17, %s139_s24  }
   0xd   : > { %p207_p10 = pnand %p777_p6, %p206_p9 }
   0xe   : > { %p247_p11 = scmp.lt.s32.totalorder (!%p207_p10), %s985_s18, 1  ;;  %s995_s12 = smov (!%p207_p10), 1  }
   0xf   : > { %210 = sbr.rel (%p207_p10) target bundleno = 1220 (0x4c4), region = 36  ;;  %s996_s24 = smov (!%p207_p10), 2  }
  0x10   : > { %s997_s26 = smov (!%p207_p10), 4   ;;  %s998_s29 = smov (!%p207_p10), 8  }
  0x14   : > { %v281_v0 = vld [vmem:[%s1207_s3 + $0x8] sm:$0xff]  ;;  %v280_v1 = vld [vmem:[%s1207_s3] sm:$0xff]  ;;  %s1089_s7 = scalar_select %p247_p11, %s985_s18, 1  ;;  %vm282_vm0 = vcmask 130048   ;;  %v366_v8 = vlaneseq  ;;  %vm377_vm1 = vcmask 7168   ;;  %vm394_vm4 = vcmask 15360  }
  0x15   : > { %820 = vmatprep.subr.mxu0 %v281_v0  ;;  %vm413_vm7 = vcmask 31744   ;;  %vm432_vm10 = vcmask 64512  }
  0x16   : > { %821 = vmatpush3.msra.mxu0 %v281_v0  ;;  %s800_s8 = sshll.u32 %s1089_s7, 4  ;;  %v1101_v9 = vshrl.u32 %v366_v8, 7  ;;  %s801_s13 = sshll.u32 %s1089_s7, 5  ;;  %v444_v44 = vand.u32 127, %v366_v8 }
  0x17   : > { %822 = vmatprep.subr.mxu0 %v280_v1  ;;  %s254_s11 = scalar_lea.vmem %s1204_s0, %s800_s8  ;;  %s260_s22 = scalar_lea.vmem %s1205_s1, %s801_s13 }
  0x18   : > { %823 = vmatpush3.msra.mxu0 %v280_v1  ;;  %v268_v2 = vld [vmem:[%s254_s11] sm:$0xff]  ;;  %v269_v3 = vld [vmem:[%s254_s11 + $0x8] sm:$0xff]  ;;  %v380_v10 = vand.u32 1, %v1101_v9  ;;  %v1105_v11 = vadd.s32 8, %v1101_v9  ;;  %v274_v12 = vld [vmem:[%s260_s22 + $0x18] sm:$0xff]  ;;  %v397_v23 = vshra.s32 %v1101_v9, 1  ;;  %v445_v47 = vsub.s32 %v444_v44, %v1101_v9  ;;  %s265_s6 = scalar_lea.vmem %s1206_s2, %s801_s13 }
  0x19   : > { %824 = vmatprep.mubr.msk.f32.mxu0 %vm282_vm0, %v268_v2  ;;  %835 = vmatprep.mubr.msk.f32.mxu1 %vm282_vm0, %v268_v2  ;;  %v273_v13 = vld [vmem:[%s260_s22 + $0x10] sm:$0xff]  ;;  %v272_v18 = vld [vmem:[%s260_s22 + $0x8] sm:$0xff]  ;;  %v271_v22 = vld [vmem:[%s260_s22] sm:$0xff]  ;;  %v416_v33 = vshra.s32 %v1101_v9, 2  ;;  %v435_v43 = vshra.s32 %v1101_v9, 3  ;;  %s243_s7 = sand.u32 1, %s977_s16  }
  0x1a   : > { %825 = vmatmul.mubr.msk.f32.vlgmr.msra.gmra.mxu0 %vm282_vm0, %v269_v3  ;;  %vm382_vm2 = vcmp.eq.s32.totalorder %v380_v10, 1  ;;  %v381_v14 = vand.u32 1, %v1105_v11  ;;  %827 = vmatprep.subr.msk.mxu1 %vm282_vm0, %v274_v12  ;;  %v399_v24 = vand.u32 1, %v397_v23  ;;  %v398_v25 = vshra.s32 %v1105_v11, 1  ;;  %s778_s8 = sshll.u32 %s243_s7, 4  ;;  %s803_s11 = sshll.u32 %s985_s18, 8 }
  0x1b   : > { %828 = vmatpush3.xpose.msk.msra.mxu1 %vm282_vm0, %v274_v12  ;;  %v418_v34 = vand.u32 1, %v416_v33  ;;  %v417_v35 = vshra.s32 %v1105_v11, 2  ;;  %v437_v45 = vand.u32 1, %v435_v43  ;;  %v436_v46 = vshra.s32 %v1105_v11, 3  ;;  %v279_v12 = vld [vmem:[%s265_s6 + $0x18] sm:$0xff]  ;;  %s245_s9 = scalar_lea.vmem [#allocation2], %s778_s8  ;;  %s1155_s14 = scalar_lea.hbm %s1208_s4, %s803_s11 }
  0x1c   : > { %829 = vmatprep.subr.msk.mxu1 %vm282_vm0, %v273_v13  ;;  %vm383_vm3 = vcmp.eq.s32.totalorder %v381_v14, 1  ;;  %vm401_vm5 = vcmp.eq.s32.totalorder %v399_v24, 1  ;;  %v400_v26 = vand.u32 1, %v398_v25  ;;  %vm447_vm12 = vcmp.ge.s32.totalorder %v445_v47, 0  ;;  %838 = vmatprep.subr.mxu0 %v279_v12  ;;  %v277_v14 = vld [vmem:[%s265_s6 + $0x8] sm:$0xff]  ;;  %s666_s10 = sshll.u32 %s245_s9, 4  ;;  %s1149_s10 = int_to_ptr.vmem [resolvable:$true] %s666_s10 }
  0x1d   : > { %vm420_vm8 = vcmp.eq.s32.totalorder %v418_v34, 1  ;;  %v419_v36 = vand.u32 1, %v417_v35  ;;  %vm439_vm11 = vcmp.eq.s32.totalorder %v437_v45, 1  ;;  %v438_v49 = vand.u32 1, %v436_v46  ;;  %839 = vmatpush3.msra.mxu0 %v279_v12  ;;  %s1158_s21 = scalar_lea.sflag [#allocation3], %s243_s7  ;;  %s917_s22 = scalar_lea.vmem %s1149_s10, 256 }
  0x1e   : > { %vm402_vm6 = vcmp.eq.s32.totalorder %v400_v26, 1  ;;  %vm449_vm13 = vcmp.lt.s32.totalorder %v445_v47, 16  ;;  %v446_v52 = vsub.s32 %v444_v44, %v1105_v11  ;;  %p918_p12 = scmp.ne.s32.totalorder %s1149_s10, %s917_s22  ;;  %s999_s18 = smov [#allocation2]  }
  0x1f   : > { %830 = vmatpush3.xpose.msk.msra.mxu1 %vm282_vm0, %v273_v13  ;;  %vm421_vm9 = vcmp.eq.s32.totalorder %v419_v36, 1  ;;  %vm440_vm14 = vcmp.eq.s32.totalorder %v438_v49, 1  ;;  %vm451_vm15 = vmand %vm447_vm12, %vm449_vm13  ;;  %v278_v13 = vld [vmem:[%s265_s6 + $0x10] sm:$0xff] }
  0x20   : > { %831 = vmatprep.subr.msk.mxu1 %vm282_vm0, %v272_v18  ;;  %840 = vmatprep.subr.mxu0 %v278_v13  ;;  %p919_p13 = pnand %p918_p12, %p1066_p4 }
  0x21   : > { %841 = vmatpush3.msra.mxu0 %v278_v13 }
  0x22   : > { %842 = vmatprep.subr.mxu0 %v277_v14  ;;  %p920_p0 = pneg %p919_p13 }
  0x23   : > { %832 = vmatpush3.xpose.msk.msra.mxu1 %vm282_vm0, %v272_v18  ;;  %843 = vmatpush3.msra.mxu0 %v277_v14 }
  0x24   : > { %833 = vmatprep.subr.msk.mxu1 %vm282_vm0, %v271_v22 }
  0x27   : > { %834 = vmatpush3.xpose.msk.msra.mxu1 %vm282_vm0, %v271_v22 }
  0x2a   : > { %836 = vmatmul.mubr.msk.f32.vlgmr.msra.gmra.mxu1 %vm282_vm0, %v269_v3 }
  0xda   : > { %v826_v4 = vpop.f32.mrf.mxu0 }
  0xdb   : > { %v365_v7 = vsel %vm282_vm0, %v826_v4, 0.0 }
  0xdc   : > { %v355_v5 = vpop.f32.mrf.mxu0 }
  0xdd   : > { %v364_v6 = vsel %vm282_vm0, %v355_v5, 0.0 }
  0xde   : > { %371 = vrot.lane.b32.xlu0 %v364_v6, %s995_s12 }
  0xe2   : > { %373 = vrot.lane.b32.xlu0 %v365_v7, %s995_s12 }
  0xea   : > { %v837_v48 = vpop.f32.mrf.mxu1 }
  0xec   : > { %v531_v53 = vpop.f32.mrf.mxu1 }
 0x150   : > { %v372_v15 = vpop.permute.xlu0 %371 }
 0x151   : > { %v378_v16 = vsel %vm377_vm1, 0.0, %v372_v15  ;;  %v276_v15 = vld [vmem:[%s265_s6] sm:$0xff] }
 0x152   : > { %v384_v17 = vsel %vm382_vm2, %v378_v16, %v364_v6  ;;  %vm448_vm2 = vcmp.ge.s32.totalorder %v446_v52, 0  ;;  %844 = vmatprep.subr.mxu0 %v276_v15 }
 0x153   : > { %388 = vrot.lane.b32.xlu1 %v384_v17, %s996_s24  ;;  %845 = vmatpush3.msra.mxu0 %v276_v15 }
 0x154   : > { %v374_v19 = vpop.permute.xlu0 %373 }
 0x155   : > { %v379_v20 = vsel %vm377_vm1, 0.0, %v374_v19  ;;  %vm544_vm1 = vcmask 261120  }
 0x156   : > { %v385_v21 = vsel %vm383_vm3, %v379_v20, %v365_v7  ;;  %vm450_vm3 = vcmp.lt.s32.totalorder %v446_v52, 16 }
 0x157   : > { %390 = vrot.lane.b32.xlu1 %v385_v21, %s996_s24  ;;  %s921_s24 = sshll.u32 %s999_s18, 4  ;;  %s922_s24 = int_to_ptr.vmem [resolvable:$false] %s921_s24 }
 0x158   : > { %p924_p1 = scmp.lt.s32.totalorder %s1149_s10, %s922_s24 }
 0x1c5   : > { %v389_v27 = vpop.permute.xlu1 %388 }
 0x1c6   : > { %v395_v28 = vsel %vm394_vm4, 0.0, %v389_v27 }
 0x1c7   : > { %v403_v29 = vsel %vm401_vm5, %v395_v28, %v384_v17 }
 0x1c8   : > { %407 = vrot.lane.b32.xlu0 %v403_v29, %s997_s26 }
 0x1c9   : > { %v391_v30 = vpop.permute.xlu1 %390 }
 0x1ca   : > { %v396_v31 = vsel %vm394_vm4, 0.0, %v391_v30  ;;  %vm452_vm4 = vmand %vm448_vm2, %vm450_vm3 }
 0x1cb   : > { %v404_v32 = vsel %vm402_vm6, %v396_v31, %v385_v21 }
 0x1cc   : > { %409 = vrot.lane.b32.xlu1 %v404_v32, %s997_s26  ;;  %s923_s26 = scalar_lea.vmem %s922_s24, 512 }
 0x1cd   : > { %p925_p2 = scmp.lt.s32.totalorder %s923_s26, %s917_s22 }
 0x1cf   : > { %p926_p3 = por %p925_p2, %p924_p1 }
 0x1d1   : > { %p927_p5 = pnand %p926_p3, %p920_p0 }
 0x23a   : > { %v408_v37 = vpop.permute.xlu0 %407 }
 0x23b   : > { %v414_v38 = vsel %vm413_vm7, 0.0, %v408_v37 }
 0x23c   : > { %v422_v39 = vsel %vm420_vm8, %v414_v38, %v403_v29 }
 0x23d   : > { %426 = vrot.lane.b32.xlu0 %v422_v39, %s998_s29 }
 0x23e   : > { %v410_v40 = vpop.permute.xlu1 %409 }
 0x23f   : > { %v415_v41 = vsel %vm413_vm7, 0.0, %v410_v40 }
 0x240   : > { %v423_v42 = vsel %vm421_vm9, %v415_v41, %v404_v32 }
 0x241   : > { %428 = vrot.lane.b32.xlu1 %v423_v42, %s998_s29 }
 0x2af   : > { %v427_v50 = vpop.permute.xlu0 %426 }
 0x2b0   : > { %v433_v51 = vsel %vm432_vm10, 0.0, %v427_v50 }
 0x2b1   : > { %v441_v54 = vsel %vm439_vm11, %v433_v51, %v422_v39 }
 0x2b2   : > { %v532_v55 = vadd.f32 %v531_v53, %v441_v54 }
 0x2b3   : > { %v429_v56 = vpop.permute.xlu1 %428 }
 0x2b4   : > { %v434_v57 = vsel %vm432_vm10, 0.0, %v429_v56  ;;  %v540_v58 = vmul.f32 0.25, %v532_v55 }
 0x2b5   : > { %v442_v59 = vsel %vm440_vm14, %v434_v57, %v423_v42 }
 0x2b6   : > { %v537_v60 = vadd.f32 %v837_v48, %v442_v59  ;;  %v542_v61 = vsel %vm451_vm15, %v540_v58, -1e+30 }
 0x2b7   : > { %v545_v62 = vsel %vm544_vm1, %v542_v61, -inf }
 0x2b8   : > { %546 = vmax.xlane.f32.xlu0 %v545_v62  ;;  %v541_v63 = vmul.f32 0.25, %v537_v60 }
 0x2ba   : > { %v543_v0 = vsel %vm452_vm4, %v541_v63, -1e+30 }
 0x2bb   : > { %v548_v1 = vsel %vm544_vm1, %v543_v0, -inf }
 0x2bc   : > { %549 = vmax.xlane.f32.xlu1 %v548_v1 }
 0x341   : > { %v547_v2 = vpop.xlane.xlu0 %546 }
 0x342   : > { %v551_v3 = vsub.f32 %v542_v61, %v547_v2 }
 0x344   : > { %v553_v4 = vmul.f32 1.442695, %v551_v3 }
 0x345   : > { %v550_v5 = vpop.xlane.xlu1 %549 }
 0x346   : > { %909 = vpow2.f32 %v553_v4  ;;  %v552_v6 = vsub.f32 %v543_v0, %v550_v5 }
 0x348   : > { %v555_v7 = vmul.f32 1.442695, %v552_v6 }
 0x34a   : > { %911 = vpow2.f32 %v555_v7 }
 0x353   : > { %v910_v8 = vpop.eup %909 }
 0x354   : > { %v557_v9 = vsel %vm544_vm1, %v910_v8, 0.0 }
 0x355   : > { %558 = vadd.xlane.f32.xlu0 %v557_v9 }
 0x357   : > { %v912_v10 = vpop.eup %911 }
 0x358   : > { %v560_v11 = vsel %vm544_vm1, %v912_v10, 0.0 }
 0x359   : > { %561 = vadd.xlane.f32.xlu0 %v560_v11 }
 0x3de   : > { %v559_v16 = vpop.xlane.xlu0 %558 }
 0x3df   : > { %913 = vrcp.f32 %v559_v16 }
 0x3e2   : > { %v562_v17 = vpop.xlane.xlu0 %561 }
 0x3e3   : > { %915 = vrcp.f32 %v562_v17 }
 0x3ec   : > { %v914_v18 = vpop.eup %913 }
 0x3ed   : > { %v565_v19 = vmul.f32 %v914_v18, %v910_v8 }
 0x3ef   : > { %846 = vmatprep.mubr.msk.f32.mxu0 %vm544_vm1, %v565_v19 }
 0x3f0   : > { %v916_v20 = vpop.eup %915 }
 0x3f1   : > { %v566_v21 = vmul.f32 %v916_v20, %v912_v10 }
 0x3f3   : > { %847 = vmatmul.mubr.msk.f32.vlgmr.msra.gmra.mxu0 %vm544_vm1, %v566_v21 }
 0x4b3   : > { %v848_v22 = vpop.f32.mrf.mxu0 }
 0x4b4   : > { %649 = vst.msk [vmem:[%s245_s9 + $0x8] sm:$0xff] %vm282_vm0, %v848_v22 }
 0x4b5   : > { %v639_v23 = vpop.f32.mrf.mxu0 }
 0x4b6   : > { %648 = vst.msk [vmem:[%s245_s9] sm:$0xff] %vm282_vm0, %v639_v23 }
 0x4b7   : > { %930 = shalt.err (!%p927_p5)
}
 0x4b8   : > { %s931_s30 = scalar_lea.hbm %s1155_s14, 256  ;;  %s935_s7 = scalar_lea.hbm %s1208_s4, 512 }
 0x4b9   : > { %p932_p6 = scmp.ne.s32.totalorder %s1155_s14, %s931_s30  ;;  %p936_p10 = scmp.lt.s32.totalorder %s1155_s14, %s1208_s4 }
 0x4ba   : > { %p937_p11 = scmp.lt.s32.totalorder %s935_s7, %s931_s30 }
 0x4bb   : > { %p933_p7 = pnand %p932_p6, %p1066_p4 }
 0x4bc   : > { %p938_p12 = por %p937_p11, %p936_p10 }
 0x4bd   : > { %p934_p9 = pneg %p933_p7 }
 0x4bf   : > { %p939_p13 = pnand %p938_p12, %p934_p9 }
 0x4c1   : > { %942 = shalt.err (!%p939_p13)
}
 0x4c2   : > { %s1000_s11 = smov 128  }
 0x4c3   : > { %849 = dma.vmem_to_hbm [thread:$0]  (%p1066_p4), %s1149_s10, 256, %s1155_s14, %s1158_s21, %s1000_s11, %s1000_s11, %s998_s29  }
 0x4c4 PF: > { %p855_p0 = scmp.ge.s32.totalorder %s993_s20, 2  ;;  %s681_s12 = sand.u32 1, %s973_s15  }
 0x4c5   : > { %s682_s13 = scalar_lea.sflag [#allocation3], %s681_s12 }
 0x4c6   : > { %p852_p1 = pnand %p855_p0, %p1073_p8 }
 0x4c8   : > { %p853_p2 = pneg %p852_p1 }
 0x4ca   : > { %968 = dma.done.wait (%p853_p2), %s682_s13, 256  }
 0x4cb   : > { %970 = vsyncadd (%p853_p2), %s682_s13, 4294967040  ;;  %s17_s20 = sadd.s32 1, %s993_s20   ;;  %s1211_s15 = smov %s977_s16 }
 0x4cc   : > { %p14_p3 = scmp.ge.s32.totalorder %s17_s20, 4   ;;  %s1212_s16 = smov %s981_s17 }
 0x4cd   : > { %s1213_s17 = smov %s1079_s28  ;;  %s1214_s18 = smov %s989_s19 }
 0x4ce   : > { %s1215_s19 = smov %s1217_s23  ;;  %16 = sbr.rel (!%p14_p3) target bundleno = 4 (0x4), region = 79 }
 0x4d3   :  { %687 = vsyncpa [#allocation3], 1 }
 0x4d4   :  { %689 = vsyncpa [#allocation3 + $0x1], 1 }

</bundles_post_ra>
